<compile_context>
chip_gen: v7x
topology: tpu7x:2x2x1
jax: 0.10.0
libtpu: 0.0.40
codegen_flags: <defaults>
</compile_context>

<pallas_src>
import functools
import math

import jax
import jax.numpy as jnp
from jax import lax
from jax.experimental import pallas as pl
from jax.experimental.pallas import tpu as pltpu

EPS = 1e-5
DROPOUT_P = 0.5


def _addnorm_kernel(seed_ref, x_ref, y_ref, g_ref, b_ref, o_ref, *,
                    training, dropout_p):
    # x_ref/y_ref/o_ref: (tm, H) tiles; g_ref/b_ref: (1, H); seed_ref: SMEM (1,) int32.
    x = x_ref[...].astype(jnp.float32)
    y = y_ref[...].astype(jnp.float32)
    tm, hidden = x_ref.shape

    if training and dropout_p > 0.0:
        # Counter-based (stateless) dropout mask: hash of (seed, global element index).
        #  * tiling-independent (same mask for any tile size / megacore split)
        #  * uses only plain integer VPU ops, so it lowers both on Mosaic and in the
        #    Pallas interpreter (no pltpu.prng_* needed).
        row = lax.broadcasted_iota(jnp.int32, (tm, hidden), 0) + pl.program_id(0) * tm
        col = lax.broadcasted_iota(jnp.int32, (tm, hidden), 1)
        idx = (row * hidden + col).astype(jnp.uint32)
        seed_u = seed_ref[0].astype(jnp.uint32)
        # splitmix32-style mixer (wrapping uint32 arithmetic, logical shifts).
        h = idx * jnp.uint32(0x9E3779B9) + seed_u * jnp.uint32(0x85EBCA6B)
        h = h ^ (h >> 16)
        h = h * jnp.uint32(0x7FEB352D)
        h = h ^ (h >> 15)
        h = h * jnp.uint32(0x846CA68B)
        h = h ^ (h >> 16)
        # keep iff h >= p * 2^32  ->  P(keep) = 1 - p  (exact for p = 0.5).
        thr = min(int(dropout_p * (1 << 32)), (1 << 32) - 1)
        scale = 1.0 / (1.0 - dropout_p)
        y = jnp.where(h >= jnp.uint32(thr), y * scale, 0.0)
    # eval mode: dropout is identity.

    z = x + y
    mean = jnp.mean(z, axis=-1, keepdims=True)
    zc = z - mean
    var = jnp.mean(zc * zc, axis=-1, keepdims=True)     # biased var, matches nn.LayerNorm
    inv = lax.rsqrt(var + EPS)                          # EUP slot, free in a DMA-bound kernel
    out = zc * inv * g_ref[...].astype(jnp.float32) + b_ref[...].astype(jnp.float32)
    o_ref[...] = out.astype(o_ref.dtype)


def _choose_tile_rows(rows, hidden, itemsize, target_stream_bytes=2 * 1024 * 1024):
    """Largest row tile with ~target bytes per stream (x / y / out).

    ~2 MiB per stream amortizes the ~0.35 us per-grid-step overhead and, with
    double-buffering of 3 streams plus the in-kernel f32 temporaries, stays well
    inside the 48 MiB VMEM budget below even on v7x (64 MiB physical VMEM).
    """
    if rows * hidden * itemsize <= target_stream_bytes:
        return rows                          # single block; block == full dim is always legal
    tm = max(8, (target_stream_bytes // (hidden * itemsize)) // 8 * 8)  # multiple of 8 sublanes
    return int(min(tm, rows))


def add_norm(x, y, gamma, beta, *, seed=0, training=False, dropout_p=DROPOUT_P):
    """AddNorm forward: LayerNorm(dropout(Y) + X), normalized over the last axis."""
    assert x.shape == y.shape
    if training:
        assert 0.0 <= dropout_p < 1.0, "dropout_p must be in [0, 1) in training mode"
    orig_shape = x.shape
    H = orig_shape[-1]
    rows = math.prod(orig_shape[:-1])
    x2 = x.reshape(rows, H)
    y2 = y.reshape(rows, H)
    g2 = gamma.reshape(1, H)
    b2 = beta.reshape(1, H)

    # TODO(synk): for H < 128 (like the demo's H=32) every store is a masked vst; a
    # lane-packing variant (fold 128/H rows into one 128-wide lane block) would help,
    # but real transformer hidden sizes are multiples of 128 so it is skipped here.
    tm = _choose_tile_rows(rows, H, jnp.dtype(x2.dtype).itemsize)
    grid = (pl.cdiv(rows, tm),)

    kernel = functools.partial(_addnorm_kernel, training=training, dropout_p=dropout_p)
    seed_arr = jnp.array([seed], dtype=jnp.int32)

    out = pl.pallas_call(
        kernel,
        out_shape=jax.ShapeDtypeStruct((rows, H), x.dtype),   # keep caller's dtype on the HBM path
        grid_spec=pltpu.PrefetchScalarGridSpec(
            num_scalar_prefetch=1,                            # seed lives in SMEM
            grid=grid,
            in_specs=[
                pl.BlockSpec((tm, H), lambda i, seed: (i, 0)),  # X tile
                pl.BlockSpec((tm, H), lambda i, seed: (i, 0)),  # Y tile
                pl.BlockSpec((1, H), lambda i, seed: (0, 0)),   # gamma (broadcast)
                pl.BlockSpec((1, H), lambda i, seed: (0, 0)),   # beta  (broadcast)
            ],
            out_specs=pl.BlockSpec((tm, H), lambda i, seed: (i, 0)),
        ),
        compiler_params=pltpu.CompilerParams(
            dimension_semantics=("parallel",),                # shards row tiles across v7x's 2 TCs
            vmem_limit_bytes=48 * 1024 * 1024,                # big tiles; still < v7x 64 MiB physical
        ),
    )(seed_arr, x2, y2, g2, b2)
    return out.reshape(orig_shape)


if __name__ == "__main__":
    # Small shapes consistent with the module: (batch=2, seq=8, hidden=32).
    B, S, H = 2, 8, 32
    key = jax.random.PRNGKey(0)
    kx, ky = jax.random.split(key)
    X = jax.random.normal(kx, (B, S, H), dtype=jnp.float32)
    Y = jax.random.normal(ky, (B, S, H), dtype=jnp.float32)

    # LayerNorm params with nn.LayerNorm default init.
    gamma = jnp.ones((H,), dtype=jnp.float32)
    beta = jnp.zeros((H,), dtype=jnp.float32)

    # Eval-mode forward (dropout = identity), matches ln(Y + X).
    out = jax.block_until_ready(add_norm(X, Y, gamma, beta, training=False))

    # Reference check in plain JAX.
    z = X + Y
    mean = z.mean(-1, keepdims=True)
    var = ((z - mean) ** 2).mean(-1, keepdims=True)
    ref = (z - mean) / jnp.sqrt(var + EPS) * gamma + beta
    assert jnp.allclose(out, ref, atol=1e-5, rtol=1e-5), "mismatch vs reference"

    # Training (dropout) path: must lower/run; output must be finite and the right shape.
    out_train = jax.block_until_ready(add_norm(X, Y, gamma, beta, seed=123, training=True))
    assert out_train.shape == X.shape
    assert bool(jnp.all(jnp.isfinite(out_train)))
    # Dropout is not identity in training mode (with overwhelming probability).
    assert not jnp.allclose(out_train, ref, atol=1e-5, rtol=1e-5)

    print("KERNEL_OK")
</pallas_src>

<mosaic_0001>
module attributes {stable_mosaic.version = 11 : i64} {
  func.func @_addnorm_kernel(%arg0: i32, %arg1: memref<1xi32, #tpu.memory_space<smem>>, %arg2: memref<16x32xf32, #tpu.memory_space<vmem>>, %arg3: memref<16x32xf32, #tpu.memory_space<vmem>>, %arg4: memref<1x32xf32, #tpu.memory_space<vmem>>, %arg5: memref<1x32xf32, #tpu.memory_space<vmem>>, %arg6: memref<16x32xf32, #tpu.memory_space<vmem>>) attributes {dimension_semantics = [#tpu.dimension_semantics<parallel>], iteration_bounds = array<i64: 1>, scalar_prefetch = 1 : i64, scratch_operands = 0 : i64, tpu.core_type = #tpu.core_type<tc>, window_params = [{transform_indices = @transform_0, window_bounds = array<i64: 16, 32>}, {transform_indices = @transform_1, window_bounds = array<i64: 16, 32>}, {pipeline_mode = #tpu.pipeline_mode<synchronous>, transform_indices = @transform_2, window_bounds = array<i64: 1, 32>}, {pipeline_mode = #tpu.pipeline_mode<synchronous>, transform_indices = @transform_3, window_bounds = array<i64: 1, 32>}, {transform_indices = @transform_4, window_bounds = array<i64: 16, 32>}]} {
    %c0 = arith.constant 0 : index
    %c0_0 = arith.constant 0 : index
    %0 = vector.load %arg2[%c0, %c0_0] : memref<16x32xf32, #tpu.memory_space<vmem>>, vector<16x32xf32>
    %c0_1 = arith.constant 0 : index
    %c0_2 = arith.constant 0 : index
    %1 = vector.load %arg3[%c0_1, %c0_2] : memref<16x32xf32, #tpu.memory_space<vmem>>, vector<16x32xf32>
    %2 = arith.addf %0, %1 : vector<16x32xf32>
    %cst = arith.constant dense<0.000000e+00> : vector<16xf32>
    %3 = vector.multi_reduction <add>, %2, %cst [1] : vector<16x32xf32> to vector<16xf32>
    %4 = vector.shape_cast %3 : vector<16xf32> to vector<16x1xf32>
    %cst_3 = arith.constant 3.200000e+01 : f32
    %5 = vector.broadcast %cst_3 : f32 to vector<16x1xf32>
    %6 = arith.divf %4, %5 : vector<16x1xf32>
    %7 = vector.broadcast %6 : vector<16x1xf32> to vector<16x32xf32>
    %8 = arith.subf %2, %7 : vector<16x32xf32>
    %9 = arith.mulf %8, %8 : vector<16x32xf32>
    %cst_4 = arith.constant dense<0.000000e+00> : vector<16xf32>
    %10 = vector.multi_reduction <add>, %9, %cst_4 [1] : vector<16x32xf32> to vector<16xf32>
    %11 = vector.shape_cast %10 : vector<16xf32> to vector<16x1xf32>
    %cst_5 = arith.constant 3.200000e+01 : f32
    %12 = vector.broadcast %cst_5 : f32 to vector<16x1xf32>
    %13 = arith.divf %11, %12 : vector<16x1xf32>
    %cst_6 = arith.constant 9.99999974E-6 : f32
    %14 = vector.broadcast %cst_6 : f32 to vector<16x1xf32>
    %15 = arith.addf %13, %14 : vector<16x1xf32>
    %16 = math.rsqrt %15 : vector<16x1xf32>
    %17 = vector.broadcast %16 : vector<16x1xf32> to vector<16x32xf32>
    %18 = arith.mulf %8, %17 : vector<16x32xf32>
    %c0_7 = arith.constant 0 : index
    %c0_8 = arith.constant 0 : index
    %19 = vector.load %arg4[%c0_7, %c0_8] : memref<1x32xf32, #tpu.memory_space<vmem>>, vector<1x32xf32>
    %20 = vector.broadcast %19 : vector<1x32xf32> to vector<16x32xf32>
    %21 = arith.mulf %18, %20 : vector<16x32xf32>
    %c0_9 = arith.constant 0 : index
    %c0_10 = arith.constant 0 : index
    %22 = vector.load %arg5[%c0_9, %c0_10] : memref<1x32xf32, #tpu.memory_space<vmem>>, vector<1x32xf32>
    %23 = vector.broadcast %22 : vector<1x32xf32> to vector<16x32xf32>
    %24 = arith.addf %21, %23 : vector<16x32xf32>
    %c0_11 = arith.constant 0 : index
    %c0_12 = arith.constant 0 : index
    %25 = vector.load %arg6[%c0_11, %c0_12] : memref<16x32xf32, #tpu.memory_space<vmem>>, vector<16x32xf32>
    tpu.vector_store %arg6[%c0_11, %c0_12], %24 {strides = array<i32>} : memref<16x32xf32, #tpu.memory_space<vmem>>, vector<16x32xf32>,
    return
  }
  func.func @transform_0(%arg0: i32, %arg1: memref<1xi32, #tpu.memory_space<smem>>) -> (i32, i32) {
    %c0_i32 = arith.constant 0 : i32
    %c0_i32_0 = arith.constant 0 : i32
    return %arg0, %c0_i32 : i32, i32
  }
  func.func @transform_1(%arg0: i32, %arg1: memref<1xi32, #tpu.memory_space<smem>>) -> (i32, i32) {
    %c0_i32 = arith.constant 0 : i32
    %c0_i32_0 = arith.constant 0 : i32
    return %arg0, %c0_i32 : i32, i32
  }
  func.func @transform_2(%arg0: i32, %arg1: memref<1xi32, #tpu.memory_space<smem>>) -> (i32, i32) {
    %c0_i32 = arith.constant 0 : i32
    %c0_i32_0 = arith.constant 0 : i32
    %c0_i32_1 = arith.constant 0 : i32
    return %c0_i32, %c0_i32_0 : i32, i32
  }
  func.func @transform_3(%arg0: i32, %arg1: memref<1xi32, #tpu.memory_space<smem>>) -> (i32, i32) {
    %c0_i32 = arith.constant 0 : i32
    %c0_i32_0 = arith.constant 0 : i32
    %c0_i32_1 = arith.constant 0 : i32
    return %c0_i32, %c0_i32_0 : i32, i32
  }
  func.func @transform_4(%arg0: i32, %arg1: memref<1xi32, #tpu.memory_space<smem>>) -> (i32, i32) {
    %c0_i32 = arith.constant 0 : i32
    %c0_i32_0 = arith.constant 0 : i32
    return %arg0, %c0_i32 : i32, i32
  }
}

</mosaic_0001>

<bundles_post_ra>
// kernel: tpu_custom_call.1
= control target key start
LH: loop header
LB: loop body
LE: loop exit
PB: predicated region body
PF: predicated region fallthrough
CT: control target
= control target key end

     0   :  { %11 = vsyncpa [#allocation5], 0  ;;  %s295_s0 = inlined_call_operand.<no memory space> [shape: s32[1], index: 0, kind: input, shape index: {}]   ;;  %s296_s1 = inlined_call_operand.hbm [shape: f32[16,32], index: 1, kind: input, shape index: {}]   ;;  %s297_s2 = inlined_call_operand.hbm [shape: f32[16,32], index: 2, kind: input, shape index: {}]   ;;  %s298_s3 = inlined_call_operand.vmem [shape: f32[1,32], index: 3, kind: input, shape index: {}]   ;;  %s299_s4 = inlined_call_operand.vmem [shape: f32[1,32], index: 4, kind: input, shape index: {}]   ;;  %s300_s5 = inlined_call_operand.hbm [shape: f32[16,32], index: 5, kind: output, shape index: {}]  }
   0x1   :  { %12 = vsyncpa [#allocation8], 0 }
   0x2   :  { %13 = vsyncpa [#allocation6], 0  ;;  %s203_s18 = smov [#allocation4]   ;;  %s131_s21 = scalar_lea.hbm %s296_s1, 256 }
   0x3   :  { %s19_s0 = sshll.u32 %s203_s18, 4  ;;  %p132_p0 = scmp.ne.s32.totalorder %s296_s1, %s131_s21  ;;  %s20_s0 = int_to_ptr.vmem [resolvable:$true] %s19_s0 }
   0x4   :  { %p135_p1 = scmp.lt.u32.totalorder %s131_s21, %s296_s1 }
   0x6   :  { %p137_p2 = pnand %p135_p1, %p132_p0 }
   0x8   :  { %140 = shalt.err (!%p137_p2)
}
   0x9   :  { %s141_s26 = scalar_lea.vmem %s20_s0, 256  ;;  %p146_p4 = scmp.lt.s32.totalorder %s20_s0, %s20_s0 }
   0xa   :  { %p142_p3 = scmp.ne.s32.totalorder %s20_s0, %s141_s26  ;;  %p147_p5 = scmp.lt.s32.totalorder %s141_s26, %s141_s26 }
   0xc   :  { %p148_p6 = por %p147_p5, %p146_p4 }
   0xe   :  { %p149_p7 = pnand %p148_p6, %p142_p3 }
  0x10   :  { %152 = shalt.err (!%p149_p7)
}
  0x11   :  { %s204_s27 = smov 128   ;;  %s205_s28 = smov 8  }
  0x12   :  { %25 = dma.hbm_to_vmem [thread:$0]  %s296_s1, 256, %s20_s0, [#allocation5], %s204_s27, %s204_s27, %s205_s28  }
  0x13   :  { %s206_s6 = smov [#allocation7]   ;;  %s153_s10 = scalar_lea.hbm %s297_s2, 256 }
  0x14   :  { %s31_s7 = sshll.u32 %s206_s6, 4  ;;  %p154_p8 = scmp.ne.s32.totalorder %s297_s2, %s153_s10  ;;  %s32_s7 = int_to_ptr.vmem [resolvable:$true] %s31_s7 }
  0x15   :  { %p157_p9 = scmp.lt.u32.totalorder %s153_s10, %s297_s2 }
  0x17   :  { %p159_p10 = pnand %p157_p9, %p154_p8 }
  0x19   :  { %162 = shalt.err (!%p159_p10)
}
  0x1a   :  { %s163_s15 = scalar_lea.vmem %s32_s7, 256  ;;  %p168_p12 = scmp.lt.s32.totalorder %s32_s7, %s32_s7 }
  0x1b   :  { %p164_p11 = scmp.ne.s32.totalorder %s32_s7, %s163_s15  ;;  %p169_p13 = scmp.lt.s32.totalorder %s163_s15, %s163_s15 }
  0x1d   :  { %p170_p0 = por %p169_p13, %p168_p12 }
  0x1f   :  { %p171_p1 = pnand %p170_p0, %p164_p11 }
  0x21   :  { %174 = shalt.err (!%p171_p1)
}
  0x22   :  { %37 = dma.hbm_to_vmem [thread:$0]  %s297_s2, 256, %s32_s7, [#allocation8], %s204_s27, %s204_s27, %s205_s28  }
  0x23   :  { %197 = dma.done.wait [#allocation5], 256  }
  0x24   :  { %198 = vsyncadd [#allocation5], 4294967040 }
  0x25   :  { %199 = dma.done.wait [#allocation8], 256  }
  0x26   :  { %200 = vsyncadd [#allocation8], 4294967040  ;;  %v48_v0 = vld [vmem:[#allocation4] sm:$0xff]  ;;  %v50_v1 = vld [vmem:[#allocation7] sm:$0xff]  ;;  %vm54_vm0 = vcmask 261120   ;;  %s207_s19 = smov [#allocation9]  }
  0x27   :  { %v49_v2 = vld [vmem:[#allocation4 + $0x8] sm:$0xff]  ;;  %v52_v3 = vadd.f32 %v50_v1, %v48_v0  ;;  %v51_v4 = vld [vmem:[#allocation7 + $0x8] sm:$0xff]  ;;  %v120_v25 = vld [vmem:[%s298_s3] ss:$0 sm:$0xff]  ;;  %s107_s20 = sshll.u32 %s207_s19, 4  ;;  %s108_s20 = int_to_ptr.vmem [resolvable:$true] %s107_s20 }
  0x28   :  { %v53_v5 = vadd.f32 %v51_v4, %v49_v2  ;;  %v121_v27 = vld [vmem:[%s299_s4] ss:$0 sm:$0xff]  ;;  %s175_s21 = scalar_lea.vmem %s108_s20, 256  ;;  %p180_p3 = scmp.lt.s32.totalorder %s108_s20, %s108_s20 }
  0x29   :  { %v55_v6 = vsel %vm54_vm0, %v52_v3, 0.0  ;;  %p176_p2 = scmp.ne.s32.totalorder %s108_s20, %s175_s21  ;;  %p181_p4 = scmp.lt.s32.totalorder %s175_s21, %s175_s21 }
  0x2a   :  { %56 = vadd.xlane.f32.xlu0 %v55_v6  ;;  %v58_v7 = vsel %vm54_vm0, %v53_v5, 0.0 }
  0x2b   :  { %p182_p5 = por %p181_p4, %p180_p3 }
  0x2d   :  { %p183_p6 = pnand %p182_p5, %p176_p2 }
  0x2e   :  { %59 = vadd.xlane.f32.xlu0 %v58_v7 }
  0xb7   :  { %v57_v8 = vpop.xlane.xlu0 %56 }
  0xb8   :  { %v62_v9 = vmul.f32 0.03125, %v57_v8 }
  0xba   :  { %v64_v10 = vsub.f32 %v52_v3, %v62_v9 }
  0xbb   :  { %v60_v11 = vpop.xlane.xlu0 %59 }
  0xbc   :  { %v63_v12 = vmul.f32 0.03125, %v60_v11  ;;  %v66_v13 = vmul.f32 %v64_v10, %v64_v10 }
  0xbe   :  { %v65_v14 = vsub.f32 %v53_v5, %v63_v12  ;;  %v68_v15 = vsel %vm54_vm0, %v66_v13, 0.0 }
  0xbf   :  { %69 = vadd.xlane.f32.xlu1 %v68_v15 }
  0xc0   :  { %v67_v16 = vmul.f32 %v65_v14, %v65_v14 }
  0xc2   :  { %v71_v17 = vsel %vm54_vm0, %v67_v16, 0.0 }
  0xc3   :  { %72 = vadd.xlane.f32.xlu1 %v71_v17 }
 0x14c   :  { %v70_v18 = vpop.xlane.xlu1 %69 }
 0x14d   :  { %v74_v19 = vmul.f32 0.03125, %v70_v18 }
 0x14f   :  { %v76_v20 = vadd.f32 1e-05, %v74_v19 }
 0x150   :  { %v73_v21 = vpop.xlane.xlu1 %72 }
 0x151   :  { %127 = vrsqrt.f32 %v76_v20  ;;  %v75_v22 = vmul.f32 0.03125, %v73_v21 }
 0x153   :  { %v77_v23 = vadd.f32 1e-05, %v75_v22 }
 0x155   :  { %129 = vrsqrt.f32 %v77_v23 }
 0x15b   :  { %v128_v24 = vpop.eup %127 }
 0x15c   :  { %v80_v26 = vmul.f32 %v128_v24, %v64_v10 }
 0x15e   :  { %v89_v28 = vmul.f32 %v120_v25, %v80_v26 }
 0x15f   :  { %v130_v29 = vpop.eup %129 }
 0x160   :  { %v81_v30 = vmul.f32 %v130_v29, %v65_v14  ;;  %v98_v31 = vadd.f32 %v121_v27, %v89_v28 }
 0x162   :  { %v90_v32 = vmul.f32 %v120_v25, %v81_v30  ;;  %100 = vst.msk [vmem:[#allocation9] sm:$0xff] %vm54_vm0, %v98_v31 }
 0x164   :  { %v99_v33 = vadd.f32 %v121_v27, %v90_v32 }
 0x166   :  { %101 = vst.msk [vmem:[#allocation9 + $0x8] sm:$0xff] %vm54_vm0, %v99_v33 }
 0x167   :  { %186 = shalt.err (!%p183_p6)
}
 0x168   :  { %s187_s22 = scalar_lea.hbm %s300_s5, 256 }
 0x169   :  { %p188_p7 = scmp.ne.s32.totalorder %s300_s5, %s187_s22  ;;  %p191_p8 = scmp.lt.u32.totalorder %s187_s22, %s300_s5 }
 0x16b   :  { %p193_p9 = pnand %p191_p8, %p188_p7 }
 0x16d   :  { %196 = shalt.err (!%p193_p9)
}
 0x16e   :  { %113 = dma.vmem_to_hbm [thread:$0]  %s108_s20, 256, %s300_s5, [#allocation6], %s204_s27, %s204_s27, %s205_s28  }
 0x16f   :  { %201 = dma.done.wait [#allocation6], 256  }
 0x170   :  { %202 = vsyncadd [#allocation6], 4294967040 }
 0x171   :  { %117 = vsyncpa [#allocation5], 1 }
 0x172   :  { %118 = vsyncpa [#allocation8], 1 }
 0x173   :  { %119 = vsyncpa [#allocation6], 1 }

</bundles_post_ra>
